<compile_context>
chip_gen: v7x
topology: tpu7x:2x2x1
jax: 0.10.0
libtpu: 0.0.40
codegen_flags: <defaults>
</compile_context>

<pallas_src>
import jax
import jax.numpy as jnp
from jax.experimental import pallas as pl
from jax.experimental.pallas import tpu as pltpu

BN_EPS = 1e-5

_LANES = 128
_MAX_TILE_SUBLANES = 2048      # 2048 x 128 f32 = 1 MiB per feature per grid step
_PALLAS_MIN_BATCH = 1024       # below one full slab, a fused XLA computation is faster


# ----------------------------------------------------------------------------- kernels
def _sigmoid(z):
    # sigmoid(z) = 1 / (1 + exp(-z)); exp and the approximate reciprocal both use the
    # EUP slot, leaving the VALU slots free.
    return pl.reciprocal(1.0 + jnp.exp(-z), approx=True)


def _bn_stats_kernel(xv_ref, xt_ref, acc_ref):
    """Accumulate per-lane [sum(xv); sum(xv^2); sum(xt); sum(xt^2)] into acc_ref (4,128)."""
    @pl.when(pl.program_id(0) == 0)
    def _init():
        acc_ref[...] = jnp.zeros_like(acc_ref)

    xv = xv_ref[...]
    xt = xt_ref[...]
    acc_ref[...] += jnp.concatenate(
        [
            jnp.sum(xv, axis=0, keepdims=True),
            jnp.sum(xv * xv, axis=0, keepdims=True),
            jnp.sum(xt, axis=0, keepdims=True),
            jnp.sum(xt * xt, axis=0, keepdims=True),
        ],
        axis=0,
    )


def _bn_mlp_kernel(coef_ref, xv_ref, xt_ref, o_ref):
    """coef_ref: scalar-prefetched SMEM f32[9]:
         [0:4] w1' (fc1 weight with BN scale folded in, row-major [out, in])
         [4:6] b1' (fc1 bias with BN shift folded in)
         [6:8] w2  (fc2 weight)
         [8]   b2  (fc2 bias)
    """
    xv = xv_ref[...]
    xt = xt_ref[...]
    z0 = xv * coef_ref[0] + xt * coef_ref[1] + coef_ref[4]
    z1 = xv * coef_ref[2] + xt * coef_ref[3] + coef_ref[5]
    h0 = _sigmoid(z0)
    h1 = _sigmoid(z1)
    z2 = h0 * coef_ref[6] + h1 * coef_ref[7] + coef_ref[8]
    o_ref[...] = _sigmoid(z2).astype(o_ref.dtype)


# ----------------------------------------------------------------------------- wrapper
def _tiling(batch):
    rows = -(-batch // _LANES)                      # lane-dense rows of 128 elements
    rows = -(-rows // 8) * 8                        # sublane granularity
    num_tiles = -(-rows // _MAX_TILE_SUBLANES)
    tile_rows = -(-rows // num_tiles)               # spread rows evenly over tiles
    tile_rows = -(-tile_rows // 8) * 8              # (bounds zero-padding waste to <8 rows/tile)
    rows_padded = num_tiles * tile_rows
    return rows_padded, tile_rows, num_tiles


def _to_slab(x, rows_padded):
    """(B,) or (B,1) -> zero-padded lane-dense (rows_padded, 128) slab."""
    x = x.reshape(-1)
    total = rows_padded * _LANES
    if total != x.shape[0]:
        x = jnp.pad(x, (0, total - x.shape[0]))     # zeros add nothing to sum / sumsq
    return x.reshape(rows_padded, _LANES)


def _feed_forward_pallas(xv, xt, params):
    batch = xv.shape[0]
    rows_padded, tile_rows, num_tiles = _tiling(batch)

    xv2d = _to_slab(xv.astype(jnp.float32), rows_padded)
    xt2d = _to_slab(xt.astype(jnp.float32), rows_padded)

    # ---- pass 1: streaming global BatchNorm statistics -----------------------
    lane_sums = pl.pallas_call(
        _bn_stats_kernel,
        out_shape=jax.ShapeDtypeStruct((4, _LANES), jnp.float32),
        grid=(num_tiles,),
        in_specs=[
            pl.BlockSpec((tile_rows, _LANES), lambda i: (i, 0)),
            pl.BlockSpec((tile_rows, _LANES), lambda i: (i, 0)),
        ],
        out_specs=pl.BlockSpec((4, _LANES), lambda i: (0, 0)),
        compiler_params=pltpu.CompilerParams(
            dimension_semantics=("arbitrary",),      # output accumulates across this axis
        ),
    )(xv2d, xt2d)

    # ---- tiny scalar glue: mean/var and fold BN affine into fc1 --------------
    s = jnp.sum(lane_sums, axis=1)                   # [sum_v, sumsq_v, sum_t, sumsq_t]
    n = jnp.float32(batch)
    mean = jnp.stack([s[0], s[2]]) / n               # per input feature (v, t)
    ex2 = jnp.stack([s[1], s[3]]) / n
    var = jnp.maximum(ex2 - mean * mean, 0.0)        # biased batch variance (BatchNorm)
    a = params["gamma"] * jax.lax.rsqrt(var + BN_EPS)    # xn_i = x_i * a_i + c_i
    c = params["beta"] - mean * a
    w1p = params["w1"] * a[None, :]                  # fold BN scale into fc1 weight
    b1p = params["b1"] + params["w1"] @ c            # fold BN shift into fc1 bias
    coef = jnp.concatenate(
        [w1p.reshape(-1), b1p, params["w2"].reshape(-1), params["b2"]]
    ).astype(jnp.float32)                            # (9,) scalars -> SMEM prefetch

    # ---- pass 2: normalize + fc1 + fc2 + sigmoids (streaming, core-parallel) -
    out2d = pl.pallas_call(
        _bn_mlp_kernel,
        out_shape=jax.ShapeDtypeStruct((rows_padded, _LANES), jnp.float32),
        grid_spec=pltpu.PrefetchScalarGridSpec(
            num_scalar_prefetch=1,
            grid=(num_tiles,),
            in_specs=[
                pl.BlockSpec((tile_rows, _LANES), lambda i, coef: (i, 0)),
                pl.BlockSpec((tile_rows, _LANES), lambda i, coef: (i, 0)),
            ],
            out_specs=pl.BlockSpec((tile_rows, _LANES), lambda i, coef: (i, 0)),
        ),
        compiler_params=pltpu.CompilerParams(
            dimension_semantics=("parallel",),       # independent tiles -> both TCs on v7x
        ),
    )(coef, xv2d, xt2d)

    return out2d.reshape(-1)[:batch].reshape(batch, 1)


def _forward_reference(xv, xt, params):
    """Pure-JAX reference mirroring the PyTorch forward (training-mode BatchNorm)."""
    x = jnp.concatenate([xv, xt], axis=-1)
    mean = jnp.mean(x, axis=0, keepdims=True)
    var = jnp.mean((x - mean) ** 2, axis=0, keepdims=True)   # biased, as BatchNorm uses
    xn = (x - mean) / jnp.sqrt(var + BN_EPS)
    xn = xn * params["gamma"][None, :] + params["beta"][None, :]
    h = jax.nn.sigmoid(xn @ params["w1"].T + params["b1"][None, :])
    return jax.nn.sigmoid(h @ params["w2"][None, :].T + params["b2"][None, :])


@jax.jit
def feed_forward(xv, xt, params):
    """xv, xt: (B, 1) float32 -> (B, 1) float32, matching FeedForward.forward."""
    batch = xv.shape[0]
    if batch < _PALLAS_MIN_BATCH:
        # Launch + DMA setup overhead dominates at tiny B; let XLA fuse the whole thing.
        return _forward_reference(xv, xt, params)
    return _feed_forward_pallas(xv, xt, params)


def init_params(key):
    k1, k2, k3, k4, k5, k6 = jax.random.split(key, 6)
    return {
        # BatchNorm1d(2) affine params (randomized so the gamma/beta folding is exercised)
        "gamma": jax.random.uniform(k5, (2,), jnp.float32, 0.5, 1.5),
        "beta": jax.random.uniform(k6, (2,), jnp.float32, -0.5, 0.5),
        # fc1: Linear(2, 2)  (PyTorch layout: weight [out, in])
        "w1": jax.random.uniform(k1, (2, 2), jnp.float32, -0.7, 0.7),
        "b1": jax.random.uniform(k2, (2,), jnp.float32, -0.7, 0.7),
        # fc2: Linear(2, 1)  (weight [1, 2] flattened to (2,))
        "w2": jax.random.uniform(k3, (2,), jnp.float32, -0.7, 0.7),
        "b2": jax.random.uniform(k4, (1,), jnp.float32, -0.7, 0.7),
    }


if __name__ == "__main__":
    key = jax.random.PRNGKey(0)
    kp, kv, kt = jax.random.split(key, 3)

    # Small shapes: B=2000 keeps everything tiny (~8 KB per input) while still being large
    # enough that the public entry point takes the Pallas path, and not a multiple of 128
    # so the ragged / zero-padded tail of the lane-dense slab is exercised.
    B = 2000
    params = init_params(kp)
    xv = jax.random.normal(kv, (B, 1), jnp.float32)
    xt = jax.random.normal(kt, (B, 1), jnp.float32)

    out = jax.block_until_ready(feed_forward(xv, xt, params))
    ref = _forward_reference(xv, xt, params)
    assert out.shape == (B, 1)
    # The approximate EUP reciprocal inside the in-kernel sigmoid keeps |error| far below
    # this threshold; anything structurally wrong would be off by >> 1e-2.
    max_err = float(jnp.max(jnp.abs(out - ref)))
    assert max_err < 1e-2, max_err

    # Tiny-batch path dispatches to the fused XLA fallback; check it too.
    out_small = jax.block_until_ready(feed_forward(xv[:8], xt[:8], params))
    ref_small = _forward_reference(xv[:8], xt[:8], params)
    assert out_small.shape == (8, 1)
    assert float(jnp.max(jnp.abs(out_small - ref_small))) < 1e-2

    print("KERNEL_OK")
</pallas_src>

<mosaic_0001>
module attributes {stable_mosaic.version = 11 : i64} {
  func.func @_bn_stats_kernel(%arg0: i32, %arg1: memref<16x128xf32, #tpu.memory_space<vmem>>, %arg2: memref<16x128xf32, #tpu.memory_space<vmem>>, %arg3: memref<4x128xf32, #tpu.memory_space<vmem>>) attributes {dimension_semantics = [#tpu.dimension_semantics<arbitrary>], iteration_bounds = array<i64: 1>, scalar_prefetch = 0 : i64, scratch_operands = 0 : i64, tpu.core_type = #tpu.core_type<tc>, window_params = [{transform_indices = @transform_0, window_bounds = array<i64: 16, 128>}, {transform_indices = @transform_1, window_bounds = array<i64: 16, 128>}, {pipeline_mode = #tpu.pipeline_mode<synchronous>, transform_indices = @transform_2, window_bounds = array<i64: 4, 128>}]} {
    %c0_i32 = arith.constant 0 : i32
    %0 = arith.cmpi eq, %arg0, %c0_i32 : i32
    %1 = arith.extui %0 : i1 to i32
    %c0_i32_0 = arith.constant 0 : i32
    %2 = arith.cmpi ne, %1, %c0_i32_0 : i32
    scf.if %2 {
      %cst_11 = arith.constant 0.000000e+00 : f32
      %19 = vector.broadcast %cst_11 : f32 to vector<4x128xf32>
      %c0_12 = arith.constant 0 : index
      %c0_13 = arith.constant 0 : index
      %20 = vector.load %arg3[%c0_12, %c0_13] : memref<4x128xf32, #tpu.memory_space<vmem>>, vector<4x128xf32>
      tpu.vector_store %arg3[%c0_12, %c0_13], %19 {strides = array<i32>} : memref<4x128xf32, #tpu.memory_space<vmem>>, vector<4x128xf32>,
    } else {
    }
    %c0 = arith.constant 0 : index
    %c0_1 = arith.constant 0 : index
    %3 = vector.load %arg1[%c0, %c0_1] : memref<16x128xf32, #tpu.memory_space<vmem>>, vector<16x128xf32>
    %c0_2 = arith.constant 0 : index
    %c0_3 = arith.constant 0 : index
    %4 = vector.load %arg2[%c0_2, %c0_3] : memref<16x128xf32, #tpu.memory_space<vmem>>, vector<16x128xf32>
    %c0_4 = arith.constant 0 : index
    %c0_5 = arith.constant 0 : index
    %5 = vector.load %arg3[%c0_4, %c0_5] : memref<4x128xf32, #tpu.memory_space<vmem>>, vector<4x128xf32>
    %cst = arith.constant dense<0.000000e+00> : vector<128xf32>
    %6 = vector.multi_reduction <add>, %3, %cst [0] : vector<16x128xf32> to vector<128xf32>
    %7 = vector.shape_cast %6 : vector<128xf32> to vector<1x128xf32>
    %8 = arith.mulf %3, %3 : vector<16x128xf32>
    %cst_6 = arith.constant dense<0.000000e+00> : vector<128xf32>
    %9 = vector.multi_reduction <add>, %8, %cst_6 [0] : vector<16x128xf32> to vector<128xf32>
    %10 = vector.shape_cast %9 : vector<128xf32> to vector<1x128xf32>
    %cst_7 = arith.constant dense<0.000000e+00> : vector<128xf32>
    %11 = vector.multi_reduction <add>, %4, %cst_7 [0] : vector<16x128xf32> to vector<128xf32>
    %12 = vector.shape_cast %11 : vector<128xf32> to vector<1x128xf32>
    %13 = arith.mulf %4, %4 : vector<16x128xf32>
    %cst_8 = arith.constant dense<0.000000e+00> : vector<128xf32>
    %14 = vector.multi_reduction <add>, %13, %cst_8 [0] : vector<16x128xf32> to vector<128xf32>
    %15 = vector.shape_cast %14 : vector<128xf32> to vector<1x128xf32>
    %16 = tpu.concatenate %7, %10, %12, %15 in 0 : vector<1x128xf32>, vector<1x128xf32>, vector<1x128xf32>, vector<1x128xf32> -> vector<4x128xf32>
    %17 = arith.addf %5, %16 : vector<4x128xf32>
    %c0_9 = arith.constant 0 : index
    %c0_10 = arith.constant 0 : index
    %18 = vector.load %arg3[%c0_9, %c0_10] : memref<4x128xf32, #tpu.memory_space<vmem>>, vector<4x128xf32>
    tpu.vector_store %arg3[%c0_9, %c0_10], %17 {strides = array<i32>} : memref<4x128xf32, #tpu.memory_space<vmem>>, vector<4x128xf32>,
    return
  }
  func.func @transform_0(%arg0: i32) -> (i32, i32) {
    %c0_i32 = arith.constant 0 : i32
    %c0_i32_0 = arith.constant 0 : i32
    return %arg0, %c0_i32 : i32, i32
  }
  func.func @transform_1(%arg0: i32) -> (i32, i32) {
    %c0_i32 = arith.constant 0 : i32
    %c0_i32_0 = arith.constant 0 : i32
    return %arg0, %c0_i32 : i32, i32
  }
  func.func @transform_2(%arg0: i32) -> (i32, i32) {
    %c0_i32 = arith.constant 0 : i32
    %c0_i32_0 = arith.constant 0 : i32
    %c0_i32_1 = arith.constant 0 : i32
    return %c0_i32, %c0_i32_0 : i32, i32
  }
}

module attributes {stable_mosaic.version = 11 : i64} {
  func.func @_bn_mlp_kernel(%arg0: i32, %arg1: memref<9xf32, #tpu.memory_space<smem>>, %arg2: memref<16x128xf32, #tpu.memory_space<vmem>>, %arg3: memref<16x128xf32, #tpu.memory_space<vmem>>, %arg4: memref<16x128xf32, #tpu.memory_space<vmem>>) attributes {dimension_semantics = [#tpu.dimension_semantics<parallel>], iteration_bounds = array<i64: 1>, scalar_prefetch = 1 : i64, scratch_operands = 0 : i64, tpu.core_type = #tpu.core_type<tc>, window_params = [{transform_indices = @transform_0, window_bounds = array<i64: 16, 128>}, {transform_indices = @transform_1, window_bounds = array<i64: 16, 128>}, {transform_indices = @transform_2, window_bounds = array<i64: 16, 128>}]} {
    %c0 = arith.constant 0 : index
    %c0_0 = arith.constant 0 : index
    %0 = vector.load %arg2[%c0, %c0_0] : memref<16x128xf32, #tpu.memory_space<vmem>>, vector<16x128xf32>
    %c0_1 = arith.constant 0 : index
    %c0_2 = arith.constant 0 : index
    %1 = vector.load %arg3[%c0_1, %c0_2] : memref<16x128xf32, #tpu.memory_space<vmem>>, vector<16x128xf32>
    %c0_3 = arith.constant 0 : index
    %2 = memref.load %arg1[%c0_3] : memref<9xf32, #tpu.memory_space<smem>>
    %3 = vector.broadcast %2 : f32 to vector<16x128xf32>
    %4 = arith.mulf %0, %3 : vector<16x128xf32>
    %c1 = arith.constant 1 : index
    %5 = memref.load %arg1[%c1] : memref<9xf32, #tpu.memory_space<smem>>
    %6 = vector.broadcast %5 : f32 to vector<16x128xf32>
    %7 = arith.mulf %1, %6 : vector<16x128xf32>
    %8 = arith.addf %4, %7 : vector<16x128xf32>
    %c4 = arith.constant 4 : index
    %9 = memref.load %arg1[%c4] : memref<9xf32, #tpu.memory_space<smem>>
    %10 = vector.broadcast %9 : f32 to vector<16x128xf32>
    %11 = arith.addf %8, %10 : vector<16x128xf32>
    %c2 = arith.constant 2 : index
    %12 = memref.load %arg1[%c2] : memref<9xf32, #tpu.memory_space<smem>>
    %13 = vector.broadcast %12 : f32 to vector<16x128xf32>
    %14 = arith.mulf %0, %13 : vector<16x128xf32>
    %c3 = arith.constant 3 : index
    %15 = memref.load %arg1[%c3] : memref<9xf32, #tpu.memory_space<smem>>
    %16 = vector.broadcast %15 : f32 to vector<16x128xf32>
    %17 = arith.mulf %1, %16 : vector<16x128xf32>
    %18 = arith.addf %14, %17 : vector<16x128xf32>
    %c5 = arith.constant 5 : index
    %19 = memref.load %arg1[%c5] : memref<9xf32, #tpu.memory_space<smem>>
    %20 = vector.broadcast %19 : f32 to vector<16x128xf32>
    %21 = arith.addf %18, %20 : vector<16x128xf32>
    %cst = arith.constant 0.000000e+00 : f32
    %22 = vector.broadcast %cst : f32 to vector<16x128xf32>
    %23 = arith.subf %22, %11 : vector<16x128xf32>
    %24 = math.exp %23 : vector<16x128xf32>
    %cst_4 = arith.constant 1.000000e+00 : f32
    %25 = vector.broadcast %cst_4 : f32 to vector<16x128xf32>
    %26 = arith.addf %25, %24 : vector<16x128xf32>
    %27 = tpu.reciprocal %26 {approx = true} : vector<16x128xf32> -> vector<16x128xf32>
    %cst_5 = arith.constant 0.000000e+00 : f32
    %28 = vector.broadcast %cst_5 : f32 to vector<16x128xf32>
    %29 = arith.subf %28, %21 : vector<16x128xf32>
    %30 = math.exp %29 : vector<16x128xf32>
    %cst_6 = arith.constant 1.000000e+00 : f32
    %31 = vector.broadcast %cst_6 : f32 to vector<16x128xf32>
    %32 = arith.addf %31, %30 : vector<16x128xf32>
    %33 = tpu.reciprocal %32 {approx = true} : vector<16x128xf32> -> vector<16x128xf32>
    %c6 = arith.constant 6 : index
    %34 = memref.load %arg1[%c6] : memref<9xf32, #tpu.memory_space<smem>>
    %35 = vector.broadcast %34 : f32 to vector<16x128xf32>
    %36 = arith.mulf %27, %35 : vector<16x128xf32>
    %c7 = arith.constant 7 : index
    %37 = memref.load %arg1[%c7] : memref<9xf32, #tpu.memory_space<smem>>
    %38 = vector.broadcast %37 : f32 to vector<16x128xf32>
    %39 = arith.mulf %33, %38 : vector<16x128xf32>
    %40 = arith.addf %36, %39 : vector<16x128xf32>
    %c8 = arith.constant 8 : index
    %41 = memref.load %arg1[%c8] : memref<9xf32, #tpu.memory_space<smem>>
    %42 = vector.broadcast %41 : f32 to vector<16x128xf32>
    %43 = arith.addf %40, %42 : vector<16x128xf32>
    %cst_7 = arith.constant 0.000000e+00 : f32
    %44 = vector.broadcast %cst_7 : f32 to vector<16x128xf32>
    %45 = arith.subf %44, %43 : vector<16x128xf32>
    %46 = math.exp %45 : vector<16x128xf32>
    %cst_8 = arith.constant 1.000000e+00 : f32
    %47 = vector.broadcast %cst_8 : f32 to vector<16x128xf32>
    %48 = arith.addf %47, %46 : vector<16x128xf32>
    %49 = tpu.reciprocal %48 {approx = true} : vector<16x128xf32> -> vector<16x128xf32>
    %c0_9 = arith.constant 0 : index
    %c0_10 = arith.constant 0 : index
    %50 = vector.load %arg4[%c0_9, %c0_10] : memref<16x128xf32, #tpu.memory_space<vmem>>, vector<16x128xf32>
    tpu.vector_store %arg4[%c0_9, %c0_10], %49 {strides = array<i32>} : memref<16x128xf32, #tpu.memory_space<vmem>>, vector<16x128xf32>,
    return
  }
  func.func @transform_0(%arg0: i32, %arg1: memref<9xf32, #tpu.memory_space<smem>>) -> (i32, i32) {
    %c0_i32 = arith.constant 0 : i32
    %c0_i32_0 = arith.constant 0 : i32
    return %arg0, %c0_i32 : i32, i32
  }
  func.func @transform_1(%arg0: i32, %arg1: memref<9xf32, #tpu.memory_space<smem>>) -> (i32, i32) {
    %c0_i32 = arith.constant 0 : i32
    %c0_i32_0 = arith.constant 0 : i32
    return %arg0, %c0_i32 : i32, i32
  }
  func.func @transform_2(%arg0: i32, %arg1: memref<9xf32, #tpu.memory_space<smem>>) -> (i32, i32) {
    %c0_i32 = arith.constant 0 : i32
    %c0_i32_0 = arith.constant 0 : i32
    return %arg0, %c0_i32 : i32, i32
  }
}

</mosaic_0001>

<bundles_post_ra>
// kernel: feed_forward.2
= control target key start
LH: loop header
LB: loop body
LE: loop exit
PB: predicated region body
PF: predicated region fallthrough
CT: control target
= control target key end

     0   :  { %v66_v0 = vmov 0.0   ;;  %vm53_vm0 = vcmask 1040384   ;;  %vm55_vm1 = vcmask 1041408   ;;  %vm57_vm2 = vcmask 1042432   ;;  %s103_s2 = inlined_call_operand.vmem [shape: f32[4,128], index: 2, kind: output, shape index: {}]   ;;  %s104_s0 = inlined_call_operand.vmem [shape: f32[16,128], index: 0, kind: input, shape index: {}]   ;;  %s105_s1 = inlined_call_operand.vmem [shape: f32[16,128], index: 1, kind: input, shape index: {}]  }
   0x1   :  { %15 = vst [vmem:[%s103_s2] sm:$0xf] %v66_v0  ;;  %v16_v1 = vld [vmem:[%s104_s0] sm:$0xff]  ;;  %v17_v2 = vld [vmem:[%s104_s0 + $0x8] sm:$0xff] }
   0x2   :  { %v18_v3 = vld [vmem:[%s105_s1] sm:$0xff]  ;;  %v19_v4 = vld [vmem:[%s105_s1 + $0x8] sm:$0xff]  ;;  %v21_v5 = vadd.f32 %v17_v2, %v16_v1  ;;  %v28_v6 = vmul.f32 %v16_v1, %v16_v1  ;;  %v29_v7 = vmul.f32 %v17_v2, %v17_v2 }
   0x3   :  { %v44_v8 = vmul.f32 %v18_v3, %v18_v3  ;;  %v37_v9 = vadd.f32 %v19_v4, %v18_v3  ;;  %v45_v10 = vmul.f32 %v19_v4, %v19_v4 }
   0x4   :  { %v22_v11 = vrot.slane %v21_v5, 4  ;;  %v30_v12 = vadd.f32 %v29_v7, %v28_v6 }
   0x5   :  { %v38_v13 = vrot.slane %v37_v9, 4  ;;  %v46_v14 = vadd.f32 %v45_v10, %v44_v8 }
   0x6   :  { %v23_v15 = vadd.f32 %v22_v11, %v21_v5  ;;  %v31_v16 = vrot.slane %v30_v12, 4 }
   0x7   :  { %v39_v17 = vadd.f32 %v38_v13, %v37_v9  ;;  %v47_v18 = vrot.slane %v46_v14, 4 }
   0x8   :  { %v24_v19 = vrot.slane %v23_v15, 2  ;;  %v32_v20 = vadd.f32 %v31_v16, %v30_v12  ;;  %v20_v37 = vld [vmem:[%s103_s2] sm:$0xf] }
   0x9   :  { %v40_v21 = vrot.slane %v39_v17, 2  ;;  %v48_v22 = vadd.f32 %v47_v18, %v46_v14 }
   0xa   :  { %v25_v23 = vadd.f32 %v24_v19, %v23_v15  ;;  %v33_v24 = vrot.slane %v32_v20, 2 }
   0xb   :  { %v41_v25 = vadd.f32 %v40_v21, %v39_v17  ;;  %v49_v26 = vrot.slane %v48_v22, 2 }
   0xc   :  { %v26_v27 = vrot.slane %v25_v23, 1  ;;  %v34_v28 = vadd.f32 %v33_v24, %v32_v20 }
   0xd   :  { %v42_v29 = vrot.slane %v41_v25, 1  ;;  %v50_v30 = vadd.f32 %v49_v26, %v48_v22 }
   0xe   :  { %v27_v31 = vadd.f32 %v26_v27, %v25_v23  ;;  %v35_v32 = vrot.slane %v34_v28, 1 }
   0xf   :  { %v43_v33 = vadd.f32 %v42_v29, %v41_v25  ;;  %v51_v34 = vrot.slane %v50_v30, 1 }
  0x10   :  { %v36_v35 = vadd.f32 %v35_v32, %v34_v28 }
  0x11   :  { %v52_v36 = vadd.f32 %v51_v34, %v50_v30 }
  0x12   :  { %v54_v38 = vsel %vm53_vm0, %v27_v31, %v36_v35 }
  0x13   :  { %v56_v39 = vsel %vm55_vm1, %v54_v38, %v43_v33 }
  0x14   :  { %v58_v40 = vsel %vm57_vm2, %v56_v39, %v52_v36 }
  0x15   :  { %v59_v41 = vadd.f32 %v58_v40, %v20_v37 }
  0x17   :  { %60 = vst [vmem:[%s103_s2] sm:$0xf] %v59_v41 }

// kernel: feed_forward.3
= control target key start
LH: loop header
LB: loop body
LE: loop exit
PB: predicated region body
PF: predicated region fallthrough
CT: control target
= control target key end

     0   :  { %s238_s0 = inlined_call_operand.vmem [shape: f32[9], index: 0, kind: input, shape index: {}]   ;;  %s239_s1 = inlined_call_operand.vmem [shape: f32[16,128], index: 1, kind: input, shape index: {}]   ;;  %s240_s2 = inlined_call_operand.vmem [shape: f32[16,128], index: 2, kind: input, shape index: {}]   ;;  %s241_s3 = inlined_call_operand.hbm [shape: f32[16,128], index: 3, kind: output, shape index: {}]  }
   0x1   :  { %s8_s14 = sshll.u32 %s238_s0, 4  ;;  %s9_s14 = int_to_ptr.vmem [resolvable:$true] %s8_s14 }
   0x2   :  { %s149_s15 = scalar_lea.vmem %s9_s14, 16  ;;  %p154_p1 = scmp.lt.s32.totalorder %s9_s14, %s9_s14 }
   0x3   :  { %p150_p0 = scmp.ne.s32.totalorder %s9_s14, %s149_s15  ;;  %p155_p2 = scmp.lt.s32.totalorder %s149_s15, %s149_s15 }
   0x5   :  { %p156_p3 = por %p155_p2, %p154_p1 }
   0x7   :  { %p157_p4 = pnand %p156_p3, %p150_p0 }
   0x9   :  { %160 = shalt.err (!%p157_p4)  }
   0xa   :  { %s187_s16 = smov [#allocation3]  }
   0xb   :  { %11 = dma.vmem_to_smem %s9_s14, 16, %s187_s16, [#allocation2] }
   0xc   :  { %183 = dma.done.wait [#allocation2], 16 }
   0xd   :  { %184 = vsyncadd [#allocation2], 4294967280 }
   0xe   :  { %13 = sfence }
   0xf   :  { %s23_s17 = sld [smem:[#allocation3]]  ;;  %s113_s18 = sld [smem:[#allocation3 + $0x1]] }
  0x10   :  { %s114_s19 = sld [smem:[#allocation3 + $0x4]]  ;;  %s115_s20 = sld [smem:[#allocation3 + $0x2]] }
  0x11   :  { %s116_s21 = sld [smem:[#allocation3 + $0x3]]  ;;  %s117_s22 = sld [smem:[#allocation3 + $0x5]] }
  0x12   :  { %14 = vsyncpa [#allocation5], 0  ;;  %v19_v0 = vld [vmem:[%s239_s1] sm:$0xff]  ;;  %v20_v2 = vld [vmem:[%s239_s1 + $0x8] sm:$0xff]  ;;  %s118_s1 = sld [smem:[#allocation3 + $0x6]]  ;;  %s120_s30 = sld [smem:[#allocation3 + $0x8]] }
  0x13   :  { %v21_v1 = vld [vmem:[%s240_s2] sm:$0xff]  ;;  %v22_v8 = vld [vmem:[%s240_s2 + $0x8] sm:$0xff]  ;;  %s119_s2 = sld [smem:[#allocation3 + $0x7]]  ;;  %s188_s4 = smov [#allocation4]  }
  0x14   :  { %s102_s5 = sshll.u32 %s188_s4, 4  ;;  %s103_s5 = int_to_ptr.vmem [resolvable:$true] %s102_s5 }
  0x15   :  { %v24_v3 = vstv %s23_s17  ;;  %v28_v4 = vstv %s113_s18  ;;  %s161_s6 = scalar_lea.vmem %s103_s5, 256  ;;  %p166_p6 = scmp.lt.s32.totalorder %s103_s5, %s103_s5 }
  0x16   :  { %v25_v5 = vmul.f32 %v24_v3, %v19_v0  ;;  %v29_v6 = vmul.f32 %v28_v4, %v21_v1  ;;  %v38_v7 = vstv %s115_s20  ;;  %v34_v9 = vstv %s114_s19  ;;  %p162_p5 = scmp.ne.s32.totalorder %s103_s5, %s161_s6  ;;  %p167_p7 = scmp.lt.s32.totalorder %s161_s6, %s161_s6 }
  0x17   :  { %v39_v10 = vmul.f32 %v38_v7, %v19_v0  ;;  %v42_v11 = vstv %s116_s21  ;;  %v26_v12 = vmul.f32 %v24_v3, %v20_v2  ;;  %v48_v15 = vstv %s117_s22 }
  0x18   :  { %v31_v13 = vadd.f32 %v29_v6, %v25_v5  ;;  %v43_v14 = vmul.f32 %v42_v11, %v21_v1  ;;  %v30_v16 = vmul.f32 %v28_v4, %v22_v8  ;;  %v40_v17 = vmul.f32 %v38_v7, %v20_v2  ;;  %p168_p8 = por %p167_p7, %p166_p6 }
  0x19   :  { %v44_v18 = vmul.f32 %v42_v11, %v22_v8  ;;  %v72_v42 = vstv %s118_s1  ;;  %v76_v44 = vstv %s119_s2  ;;  %v82_v50 = vstv %s120_s30 }
  0x1a   :  { %v35_v19 = vadd.f32 %v34_v9, %v31_v13  ;;  %v45_v20 = vadd.f32 %v43_v14, %v39_v10  ;;  %v32_v21 = vadd.f32 %v30_v16, %v26_v12  ;;  %p169_p9 = pnand %p168_p8, %p162_p5 }
  0x1b   :  { %v46_v22 = vadd.f32 %v44_v18, %v40_v17 }
  0x1c   :  { %v49_v23 = vadd.f32 %v48_v15, %v45_v20  ;;  %v51_v24 = vsub.f32 0.0, %v35_v19  ;;  %v36_v25 = vadd.f32 %v34_v9, %v32_v21 }
  0x1d   :  { %v50_v26 = vadd.f32 %v48_v15, %v46_v22 }
  0x1e   :  { %v53_v27 = vmul.f32 1.442695, %v51_v24  ;;  %v61_v28 = vsub.f32 0.0, %v49_v23  ;;  %v52_v29 = vsub.f32 0.0, %v36_v25 }
  0x1f   :  { %v62_v30 = vsub.f32 0.0, %v50_v26 }
  0x20   :  { %125 = vpow2.f32 %v53_v27  ;;  %v63_v31 = vmul.f32 1.442695, %v61_v28  ;;  %v55_v32 = vmul.f32 1.442695, %v52_v29 }
  0x21   :  { %v65_v33 = vmul.f32 1.442695, %v62_v30 }
  0x22   :  { %127 = vpow2.f32 %v63_v31 }
  0x23   :  { %129 = vpow2.f32 %v55_v32 }
  0x24   :  { %131 = vpow2.f32 %v65_v33 }
  0x2a   :  { %v126_v34 = vpop.eup %125 }
  0x2b   :  { %v57_v35 = vadd.f32 1.0, %v126_v34 }
  0x2c   :  { %v128_v36 = vpop.eup %127 }
  0x2d   :  { %v130_v37 = vpop.eup %129  ;;  %133 = vrcp.f32 %v57_v35  ;;  %v67_v38 = vadd.f32 1.0, %v128_v36 }
  0x2e   :  { %v132_v39 = vpop.eup %131  ;;  %v58_v40 = vadd.f32 1.0, %v130_v37 }
  0x2f   :  { %135 = vrcp.f32 %v67_v38  ;;  %v68_v41 = vadd.f32 1.0, %v132_v39 }
  0x30   :  { %137 = vrcp.f32 %v58_v40 }
  0x31   :  { %139 = vrcp.f32 %v68_v41 }
  0x37   :  { %v134_v43 = vpop.eup %133 }
  0x38   :  { %v73_v45 = vmul.f32 %v134_v43, %v72_v42 }
  0x39   :  { %v136_v46 = vpop.eup %135 }
  0x3a   :  { %v138_v47 = vpop.eup %137  ;;  %v77_v48 = vmul.f32 %v136_v46, %v76_v44 }
  0x3b   :  { %v140_v49 = vpop.eup %139  ;;  %v74_v51 = vmul.f32 %v138_v47, %v72_v42 }
  0x3c   :  { %v79_v52 = vadd.f32 %v77_v48, %v73_v45  ;;  %v78_v53 = vmul.f32 %v140_v49, %v76_v44 }
  0x3e   :  { %v83_v54 = vadd.f32 %v82_v50, %v79_v52  ;;  %v80_v55 = vadd.f32 %v78_v53, %v74_v51 }
  0x40   :  { %v85_v56 = vsub.f32 0.0, %v83_v54  ;;  %v84_v57 = vadd.f32 %v82_v50, %v80_v55 }
  0x42   :  { %v87_v58 = vmul.f32 1.442695, %v85_v56  ;;  %v86_v59 = vsub.f32 0.0, %v84_v57 }
  0x44   :  { %141 = vpow2.f32 %v87_v58  ;;  %v89_v60 = vmul.f32 1.442695, %v86_v59 }
  0x46   :  { %143 = vpow2.f32 %v89_v60 }
  0x4e   :  { %v142_v61 = vpop.eup %141 }
  0x4f   :  { %v91_v62 = vadd.f32 1.0, %v142_v61 }
  0x50   :  { %v144_v63 = vpop.eup %143 }
  0x51   :  { %145 = vrcp.f32 %v91_v62  ;;  %v92_v0 = vadd.f32 1.0, %v144_v63 }
  0x53   :  { %147 = vrcp.f32 %v92_v0 }
  0x5b   :  { %v146_v1 = vpop.eup %145 }
  0x5c   :  { %95 = vst [vmem:[#allocation4] sm:$0xff] %v146_v1 }
  0x5d   :  { %v148_v2 = vpop.eup %147 }
  0x5e   :  { %96 = vst [vmem:[#allocation4 + $0x8] sm:$0xff] %v148_v2 }
  0x5f   :  { %172 = shalt.err (!%p169_p9)
}
  0x60   :  { %s173_s9 = scalar_lea.hbm %s241_s3, 256 }
  0x61   :  { %p174_p10 = scmp.ne.s32.totalorder %s241_s3, %s173_s9  ;;  %p177_p11 = scmp.lt.u32.totalorder %s173_s9, %s241_s3 }
  0x63   :  { %p179_p12 = pnand %p177_p11, %p174_p10 }
  0x65   :  { %182 = shalt.err (!%p179_p12)
}
  0x66   :  { %s189_s14 = smov 128   ;;  %s190_s15 = smov 8  }
  0x67   :  { %108 = dma.vmem_to_hbm [thread:$0]  %s103_s5, 256, %s241_s3, [#allocation5], %s189_s14, %s189_s14, %s190_s15  }
  0x68   :  { %185 = dma.done.wait [#allocation5], 256  }
  0x69   :  { %186 = vsyncadd [#allocation5], 4294967040 }
  0x6a   :  { %112 = vsyncpa [#allocation5], 1 }

</bundles_post_ra>
